<compile_context>
chip_gen: v7x
topology: tpu7x:2x2x1
jax: 0.10.0
libtpu: 0.0.40
codegen_flags: <defaults>
</compile_context>

<pallas_src>
import jax
import jax.numpy as jnp
from jax.experimental import pallas as pl
from jax.experimental.pallas import tpu as pltpu

_LANE = 128


def _round_up(n, m):
    return ((n + m - 1) // m) * m


def _pick_tile_b(B):
    if B <= 256:
        return B                                     # single grid step for small batches
    # >= 4 balanced steps (>= 2 per v7x core), 16-row multiples for bf16 packing,
    # cap at 1024 rows/step (per-step VMEM stays a few hundred KiB).
    return min(1024, _round_up(pl.cdiv(B, 4), 16))


def _mlp_kernel(x_ref, w1_ref, b1_ref, w2_ref, b2_ref, w3_ref, b3_ref, o_ref):
    # Fused 3-layer MLP on one (tile_b, used) batch tile.
    # MXU matmuls accumulate in f32; bias-add / ReLU stay in f32; cast back to the
    # weight dtype only right before the next matmul.
    pred = o_ref.shape[1]
    x = x_ref[...].astype(w1_ref.dtype)                       # cast in-kernel (no HBM copy)
    h1 = jnp.dot(x, w1_ref[...], preferred_element_type=jnp.float32)
    h1 = jnp.maximum(h1 + b1_ref[...], 0.0)
    h2 = jnp.dot(h1.astype(w2_ref.dtype), w2_ref[...], preferred_element_type=jnp.float32)
    h2 = jnp.maximum(h2 + b2_ref[...], 0.0)
    y = jnp.dot(h2.astype(w3_ref.dtype), w3_ref[...], preferred_element_type=jnp.float32)
    o_ref[...] = (y[:, :pred] + b3_ref[...]).astype(o_ref.dtype)


def prepare_params(params, *, compute_dtype=jnp.bfloat16):
    """One-time (hoisted out of the hot path) padding + cast of weights/biases.

    Weights are stored (in_features, out_features) so the kernel computes x @ W + b,
    matching PyTorch nn.Linear.  Hidden width is zero-padded to a 128-lane multiple;
    padded bias lanes are zero so padded hidden lanes stay exactly zero through ReLU.
    """
    used = params["w1"].shape[0]
    pred = params["w3"].shape[1]
    k_pad = _round_up(used, _LANE)
    n_pad = _round_up(pred, _LANE)
    cd = compute_dtype
    w1 = jnp.zeros((used, k_pad), cd).at[:, :used].set(params["w1"].astype(cd))
    w2 = jnp.zeros((k_pad, k_pad), cd).at[:used, :used].set(params["w2"].astype(cd))
    w3 = jnp.zeros((k_pad, n_pad), cd).at[:used, :pred].set(params["w3"].astype(cd))
    b1 = jnp.zeros((1, k_pad), jnp.float32).at[:, :used].set(
        params["b1"].astype(jnp.float32).reshape(1, used))
    b2 = jnp.zeros((1, k_pad), jnp.float32).at[:, :used].set(
        params["b2"].astype(jnp.float32).reshape(1, used))
    b3 = params["b3"].astype(jnp.float32).reshape(1, pred)
    return dict(w1=w1, b1=b1, w2=w2, b2=b2, w3=w3, b3=b3)


def siamese_forward(x, prepared, *, tile_b=None):
    """x: (B, used) float32.  `prepared` is the output of prepare_params()."""
    B, used = x.shape
    assert prepared["w1"].shape[0] == used, "feature width mismatch vs prepared params"
    pred = prepared["b3"].shape[1]

    if tile_b is None:
        tile_b = _pick_tile_b(B)
    grid = (pl.cdiv(B, tile_b),)

    # Weights/biases: grid-invariant index_map -> DMA'd once, revisited every step.
    full = lambda a: pl.BlockSpec(a.shape, lambda i: (0, 0))

    return pl.pallas_call(
        _mlp_kernel,
        out_shape=jax.ShapeDtypeStruct((B, pred), jnp.float32),
        grid_spec=pltpu.PrefetchScalarGridSpec(
            num_scalar_prefetch=0,
            grid=grid,
            in_specs=[
                pl.BlockSpec((tile_b, used), lambda i: (i, 0)),   # x tile, unpadded
                full(prepared["w1"]), full(prepared["b1"]),
                full(prepared["w2"]), full(prepared["b2"]),
                full(prepared["w3"]), full(prepared["b3"]),
            ],
            out_specs=pl.BlockSpec((tile_b, pred), lambda i: (i, 0)),  # unpadded output
        ),
        compiler_params=pltpu.CompilerParams(
            dimension_semantics=("parallel",),   # batch tiles split across v7x cores
        ),
    )(x, prepared["w1"], prepared["b1"], prepared["w2"], prepared["b2"],
      prepared["w3"], prepared["b3"])


def siamese_forward_pair(x1, x2, prepared, *, tile_b=None):
    """Preferred API for the Siamese use-case: run both branches through the shared
    trunk in ONE pallas_call (halves weight DMA + fixed overhead, doubles grid work
    available to v7x's two cores)."""
    B1 = x1.shape[0]
    out = siamese_forward(jnp.concatenate([x1, x2], axis=0), prepared, tile_b=tile_b)
    return out[:B1], out[B1:]


def init_params(key, used, pred):
    """Deterministic init mimicking nn.Linear's U(-1/sqrt(in), 1/sqrt(in))."""
    ks = jax.random.split(key, 6)

    def linear(kw, kb, fan_in, fan_out):
        bound = 1.0 / jnp.sqrt(float(fan_in))
        w = jax.random.uniform(kw, (fan_in, fan_out), jnp.float32, -bound, bound)
        b = jax.random.uniform(kb, (1, fan_out), jnp.float32, -bound, bound)
        return w, b

    w1, b1 = linear(ks[0], ks[1], used, used)
    w2, b2 = linear(ks[2], ks[3], used, used)
    w3, b3 = linear(ks[4], ks[5], used, pred)
    return dict(w1=w1, b1=b1, w2=w2, b2=b2, w3=w3, b3=b3)


def reference_forward(x, p, compute_dtype=jnp.float32):
    """Pure-JAX reference with the same mixed-precision recipe as the kernel."""
    cd = compute_dtype
    h1 = jnp.maximum(
        jnp.dot(x.astype(cd), p["w1"].astype(cd), preferred_element_type=jnp.float32) + p["b1"], 0.0)
    h2 = jnp.maximum(
        jnp.dot(h1.astype(cd), p["w2"].astype(cd), preferred_element_type=jnp.float32) + p["b2"], 0.0)
    return jnp.dot(h2.astype(cd), p["w3"].astype(cd), preferred_element_type=jnp.float32) + p["b3"]


if __name__ == "__main__":
    # Small shapes consistent with the module: used_days_num=32, pred_days_num=8, batch=8.
    B, used, pred = 8, 32, 8
    key = jax.random.PRNGKey(0)
    kx, kp, kx2 = jax.random.split(key, 3)
    x = jax.random.normal(kx, (B, used), dtype=jnp.float32)
    params = init_params(kp, used, pred)

    # Hoisted one-time param preparation (padding + cast) — NOT in the hot path.
    prep_f32 = prepare_params(params, compute_dtype=jnp.float32)
    prep_bf16 = prepare_params(params, compute_dtype=jnp.bfloat16)

    # 1) Exact-precision path (f32 compute): must match the pure-JAX f32 reference.
    out_f32 = jax.block_until_ready(siamese_forward(x, prep_f32))
    assert out_f32.shape == (B, pred)
    assert jnp.allclose(out_f32, reference_forward(x, params, jnp.float32),
                        atol=1e-5, rtol=1e-5), "f32 mismatch vs pure-JAX reference"

    # 2) Default fast path (bf16 MXU inputs, f32 accumulation) vs matched mixed-precision ref.
    out_bf16 = jax.block_until_ready(siamese_forward(x, prep_bf16))
    assert out_bf16.shape == (B, pred)
    assert jnp.allclose(out_bf16, reference_forward(x, params, jnp.bfloat16),
                        atol=1e-2, rtol=1e-2), "bf16 mismatch vs matched reference"

    # 3) Larger batch exercising the multi-step parallel batch grid (4 steps of 256 rows).
    B2 = 1024
    x2 = jax.random.normal(kx2, (B2, used), dtype=jnp.float32)
    out2 = jax.block_until_ready(siamese_forward(x2, prep_bf16))
    assert out2.shape == (B2, pred)
    assert jnp.allclose(out2, reference_forward(x2, params, jnp.bfloat16),
                        atol=1e-2, rtol=1e-2), "large-batch mismatch vs matched reference"

    # 4) Both Siamese branches fused into a single pallas_call.
    o1, o2 = jax.tree_util.tree_map(jax.block_until_ready,
                                    siamese_forward_pair(x, x2[:B], prep_bf16))
    assert o1.shape == (B, pred) and o2.shape == (B, pred)
    assert jnp.allclose(o1, reference_forward(x, params, jnp.bfloat16), atol=1e-2, rtol=1e-2)
    assert jnp.allclose(o2, reference_forward(x2[:B], params, jnp.bfloat16), atol=1e-2, rtol=1e-2)

    print("KERNEL_OK")
</pallas_src>

<mosaic_0001>
module attributes {stable_mosaic.version = 11 : i64} {
  func.func @_mlp_kernel(%arg0: i32, %arg1: memref<8x32xf32, #tpu.memory_space<vmem>>, %arg2: memref<32x128xf32, #tpu.memory_space<vmem>>, %arg3: memref<1x128xf32, #tpu.memory_space<vmem>>, %arg4: memref<128x128xf32, #tpu.memory_space<vmem>>, %arg5: memref<1x128xf32, #tpu.memory_space<vmem>>, %arg6: memref<128x128xf32, #tpu.memory_space<vmem>>, %arg7: memref<1x8xf32, #tpu.memory_space<vmem>>, %arg8: memref<8x8xf32, #tpu.memory_space<vmem>>) attributes {dimension_semantics = [#tpu.dimension_semantics<parallel>], iteration_bounds = array<i64: 1>, scalar_prefetch = 0 : i64, scratch_operands = 0 : i64, tpu.core_type = #tpu.core_type<tc>, window_params = [{transform_indices = @transform_0, window_bounds = array<i64: 8, 32>}, {pipeline_mode = #tpu.pipeline_mode<synchronous>, transform_indices = @transform_1, window_bounds = array<i64: 32, 128>}, {pipeline_mode = #tpu.pipeline_mode<synchronous>, transform_indices = @transform_2, window_bounds = array<i64: 1, 128>}, {pipeline_mode = #tpu.pipeline_mode<synchronous>, transform_indices = @transform_3, window_bounds = array<i64: 128, 128>}, {pipeline_mode = #tpu.pipeline_mode<synchronous>, transform_indices = @transform_4, window_bounds = array<i64: 1, 128>}, {pipeline_mode = #tpu.pipeline_mode<synchronous>, transform_indices = @transform_5, window_bounds = array<i64: 128, 128>}, {pipeline_mode = #tpu.pipeline_mode<synchronous>, transform_indices = @transform_6, window_bounds = array<i64: 1, 8>}, {transform_indices = @transform_7, window_bounds = array<i64: 8, 8>}]} {
    %c0 = arith.constant 0 : index
    %c0_0 = arith.constant 0 : index
    %0 = vector.load %arg1[%c0, %c0_0] : memref<8x32xf32, #tpu.memory_space<vmem>>, vector<8x32xf32>
    %c0_1 = arith.constant 0 : index
    %c0_2 = arith.constant 0 : index
    %1 = vector.load %arg2[%c0_1, %c0_2] : memref<32x128xf32, #tpu.memory_space<vmem>>, vector<32x128xf32>
    %cst = arith.constant dense<0.000000e+00> : vector<8x128xf32>
    %2 = tpu.matmul %0, %1, %cst {dimension_numbers = #tpu.dot_dimension_numbers<[1], [0], [0], [1], [0, 0, 1, 1], [], []>} : vector<8x32xf32>, vector<32x128xf32>, vector<8x128xf32> -> vector<8x128xf32>
    %c0_3 = arith.constant 0 : index
    %c0_4 = arith.constant 0 : index
    %3 = vector.load %arg3[%c0_3, %c0_4] : memref<1x128xf32, #tpu.memory_space<vmem>>, vector<1x128xf32>
    %4 = vector.broadcast %3 : vector<1x128xf32> to vector<8x128xf32>
    %5 = arith.addf %2, %4 : vector<8x128xf32>
    %cst_5 = arith.constant 0.000000e+00 : f32
    %6 = vector.broadcast %cst_5 : f32 to vector<8x128xf32>
    %7 = arith.maximumf %5, %6 : vector<8x128xf32>
    %c0_6 = arith.constant 0 : index
    %c0_7 = arith.constant 0 : index
    %8 = vector.load %arg4[%c0_6, %c0_7] : memref<128x128xf32, #tpu.memory_space<vmem>>, vector<128x128xf32>
    %cst_8 = arith.constant dense<0.000000e+00> : vector<8x128xf32>
    %9 = tpu.matmul %7, %8, %cst_8 {dimension_numbers = #tpu.dot_dimension_numbers<[1], [0], [0], [1], [0, 0, 1, 1], [], []>} : vector<8x128xf32>, vector<128x128xf32>, vector<8x128xf32> -> vector<8x128xf32>
    %c0_9 = arith.constant 0 : index
    %c0_10 = arith.constant 0 : index
    %10 = vector.load %arg5[%c0_9, %c0_10] : memref<1x128xf32, #tpu.memory_space<vmem>>, vector<1x128xf32>
    %11 = vector.broadcast %10 : vector<1x128xf32> to vector<8x128xf32>
    %12 = arith.addf %9, %11 : vector<8x128xf32>
    %cst_11 = arith.constant 0.000000e+00 : f32
    %13 = vector.broadcast %cst_11 : f32 to vector<8x128xf32>
    %14 = arith.maximumf %12, %13 : vector<8x128xf32>
    %c0_12 = arith.constant 0 : index
    %c0_13 = arith.constant 0 : index
    %15 = vector.load %arg6[%c0_12, %c0_13] : memref<128x128xf32, #tpu.memory_space<vmem>>, vector<128x128xf32>
    %cst_14 = arith.constant dense<0.000000e+00> : vector<8x128xf32>
    %16 = tpu.matmul %14, %15, %cst_14 {dimension_numbers = #tpu.dot_dimension_numbers<[1], [0], [0], [1], [0, 0, 1, 1], [], []>} : vector<8x128xf32>, vector<128x128xf32>, vector<8x128xf32> -> vector<8x128xf32>
    %17 = vector.extract_strided_slice %16 {offsets = [0, 0], sizes = [8, 8], strides = [1, 1]} : vector<8x128xf32> to vector<8x8xf32>
    %c0_15 = arith.constant 0 : index
    %c0_16 = arith.constant 0 : index
    %18 = vector.load %arg7[%c0_15, %c0_16] : memref<1x8xf32, #tpu.memory_space<vmem>>, vector<1x8xf32>
    %19 = vector.broadcast %18 : vector<1x8xf32> to vector<8x8xf32>
    %20 = arith.addf %17, %19 : vector<8x8xf32>
    %c0_17 = arith.constant 0 : index
    %c0_18 = arith.constant 0 : index
    %21 = vector.load %arg8[%c0_17, %c0_18] : memref<8x8xf32, #tpu.memory_space<vmem>>, vector<8x8xf32>
    tpu.vector_store %arg8[%c0_17, %c0_18], %20 {strides = array<i32>} : memref<8x8xf32, #tpu.memory_space<vmem>>, vector<8x8xf32>,
    return
  }
  func.func @transform_0(%arg0: i32) -> (i32, i32) {
    %c0_i32 = arith.constant 0 : i32
    %c0_i32_0 = arith.constant 0 : i32
    return %arg0, %c0_i32 : i32, i32
  }
  func.func @transform_1(%arg0: i32) -> (i32, i32) {
    %c0_i32 = arith.constant 0 : i32
    %c0_i32_0 = arith.constant 0 : i32
    %c0_i32_1 = arith.constant 0 : i32
    return %c0_i32, %c0_i32_0 : i32, i32
  }
  func.func @transform_2(%arg0: i32) -> (i32, i32) {
    %c0_i32 = arith.constant 0 : i32
    %c0_i32_0 = arith.constant 0 : i32
    %c0_i32_1 = arith.constant 0 : i32
    return %c0_i32, %c0_i32_0 : i32, i32
  }
  func.func @transform_3(%arg0: i32) -> (i32, i32) {
    %c0_i32 = arith.constant 0 : i32
    %c0_i32_0 = arith.constant 0 : i32
    %c0_i32_1 = arith.constant 0 : i32
    return %c0_i32, %c0_i32_0 : i32, i32
  }
  func.func @transform_4(%arg0: i32) -> (i32, i32) {
    %c0_i32 = arith.constant 0 : i32
    %c0_i32_0 = arith.constant 0 : i32
    %c0_i32_1 = arith.constant 0 : i32
    return %c0_i32, %c0_i32_0 : i32, i32
  }
  func.func @transform_5(%arg0: i32) -> (i32, i32) {
    %c0_i32 = arith.constant 0 : i32
    %c0_i32_0 = arith.constant 0 : i32
    %c0_i32_1 = arith.constant 0 : i32
    return %c0_i32, %c0_i32_0 : i32, i32
  }
  func.func @transform_6(%arg0: i32) -> (i32, i32) {
    %c0_i32 = arith.constant 0 : i32
    %c0_i32_0 = arith.constant 0 : i32
    %c0_i32_1 = arith.constant 0 : i32
    return %c0_i32, %c0_i32_0 : i32, i32
  }
  func.func @transform_7(%arg0: i32) -> (i32, i32) {
    %c0_i32 = arith.constant 0 : i32
    %c0_i32_0 = arith.constant 0 : i32
    return %arg0, %c0_i32 : i32, i32
  }
}

</mosaic_0001>

<bundles_post_ra>
// kernel: tpu_custom_call.1
= control target key start
LH: loop header
LB: loop body
LE: loop exit
PB: predicated region body
PF: predicated region fallthrough
CT: control target
= control target key end

     0   :  { %12 = vsyncpa [#allocation3], 0  ;;  %s829_s0 = inlined_call_operand.hbm [shape: f32[8,32], index: 0, kind: input, shape index: {}]   ;;  %s830_s1 = inlined_call_operand.hbm [shape: f32[32,128], index: 1, kind: input, shape index: {}]   ;;  %s831_s2 = inlined_call_operand.vmem [shape: f32[1,128], index: 2, kind: input, shape index: {}]   ;;  %s832_s3 = inlined_call_operand.hbm [shape: f32[128,128], index: 3, kind: input, shape index: {}]   ;;  %s833_s4 = inlined_call_operand.vmem [shape: f32[1,128], index: 4, kind: input, shape index: {}]   ;;  %s834_s5 = inlined_call_operand.hbm [shape: f32[128,128], index: 5, kind: input, shape index: {}]   ;;  %s835_s6 = inlined_call_operand.vmem [shape: f32[1,8], index: 6, kind: input, shape index: {}]   ;;  %s836_s7 = inlined_call_operand.hbm [shape: f32[8,8], index: 7, kind: output, shape index: {}]  }
   0x1   :  { %13 = vsyncpa [#allocation6], 0 }
   0x2   :  { %14 = vsyncpa [#allocation9], 0 }
   0x3   :  { %15 = vsyncpa [#allocation4], 0  ;;  %s680_s24 = smov [#allocation5]   ;;  %s562_s28 = scalar_lea.hbm %s830_s1, 512 }
   0x4   :  { %s31_s25 = sshll.u32 %s680_s24, 4  ;;  %p563_p0 = scmp.ne.s32.totalorder %s830_s1, %s562_s28  ;;  %s32_s25 = int_to_ptr.vmem [resolvable:$true] %s31_s25 }
   0x5   :  { %p566_p1 = scmp.lt.u32.totalorder %s562_s28, %s830_s1 }
   0x7   :  { %p568_p2 = pnand %p566_p1, %p563_p0 }
   0x9   :  { %571 = shalt.err (!%p568_p2)
}
   0xa   :  { %s572_s10 = scalar_lea.vmem %s32_s25, 512  ;;  %p577_p4 = scmp.lt.s32.totalorder %s32_s25, %s32_s25 }
   0xb   :  { %p573_p3 = scmp.ne.s32.totalorder %s32_s25, %s572_s10  ;;  %p578_p5 = scmp.lt.s32.totalorder %s572_s10, %s572_s10 }
   0xd   :  { %p579_p6 = por %p578_p5, %p577_p4 }
   0xf   :  { %p580_p7 = pnand %p579_p6, %p573_p3 }
  0x11   :  { %583 = shalt.err (!%p580_p7)
}
  0x12   :  { %s681_s11 = smov 128   ;;  %s682_s12 = smov 8  }
  0x13   :  { %37 = dma.hbm_to_vmem [thread:$0]  %s830_s1, 512, %s32_s25, [#allocation6], %s681_s11, %s681_s11, %s682_s12  }
  0x14   :  { %s683_s15 = smov [#allocation2]   ;;  %s684_s17 = smov [#allocation7]  }
  0x15   :  { %s22_s16 = sshll.u32 %s683_s15, 4  ;;  %s45_s18 = sshll.u32 %s684_s17, 4  ;;  %s23_s16 = int_to_ptr.vmem [resolvable:$true] %s22_s16  ;;  %s46_s18 = int_to_ptr.vmem [resolvable:$true] %s45_s18 }
  0x16   :  { %s584_s21 = scalar_lea.hbm %s829_s0, 128 }
  0x17   :  { %p585_p8 = scmp.ne.s32.totalorder %s829_s0, %s584_s21  ;;  %p588_p9 = scmp.lt.u32.totalorder %s584_s21, %s829_s0 }
  0x19   :  { %p590_p10 = pnand %p588_p9, %p585_p8 }
  0x1b   :  { %593 = shalt.err (!%p590_p10)
}
  0x1c   :  { %s594_s1 = scalar_lea.vmem %s23_s16, 128  ;;  %p599_p12 = scmp.lt.s32.totalorder %s23_s16, %s23_s16 }
  0x1d   :  { %p595_p11 = scmp.ne.s32.totalorder %s23_s16, %s594_s1  ;;  %p600_p13 = scmp.lt.s32.totalorder %s594_s1, %s594_s1 }
  0x1f   :  { %p601_p0 = por %p600_p13, %p599_p12 }
  0x21   :  { %p602_p1 = pnand %p601_p0, %p595_p11 }
  0x23   :  { %605 = shalt.err (!%p602_p1)
}
  0x24   :  { %25 = dma.hbm_to_vmem [thread:$0]  %s829_s0, 128, %s23_s16, [#allocation3]  }
  0x25   :  { %s606_s30 = scalar_lea.hbm %s832_s3, 2048 }
  0x26   :  { %p607_p2 = scmp.ne.s32.totalorder %s832_s3, %s606_s30  ;;  %p610_p3 = scmp.lt.u32.totalorder %s606_s30, %s832_s3 }
  0x28   :  { %p612_p4 = pnand %p610_p3, %p607_p2 }
  0x2a   :  { %615 = shalt.err (!%p612_p4)
}
  0x2b   :  { %s616_s14 = scalar_lea.vmem %s46_s18, 2048  ;;  %p621_p6 = scmp.lt.s32.totalorder %s46_s18, %s46_s18 }
  0x2c   :  { %p617_p5 = scmp.ne.s32.totalorder %s46_s18, %s616_s14  ;;  %p622_p7 = scmp.lt.s32.totalorder %s616_s14, %s616_s14 }
  0x2e   :  { %p623_p8 = por %p622_p7, %p621_p6 }
  0x30   :  { %p624_p9 = pnand %p623_p8, %p617_p5 }
  0x32   :  { %627 = shalt.err (!%p624_p9)
}
  0x33   :  { %51 = dma.hbm_to_vmem [thread:$0]  %s832_s3, 2048, %s46_s18, [#allocation6], %s681_s11, %s681_s11, %s682_s12  }
  0x34   :  { %s685_s16 = smov [#allocation8]   ;;  %s628_s21 = scalar_lea.hbm %s834_s5, 2048 }
  0x35   :  { %s59_s17 = sshll.u32 %s685_s16, 4  ;;  %p629_p10 = scmp.ne.s32.totalorder %s834_s5, %s628_s21  ;;  %s60_s17 = int_to_ptr.vmem [resolvable:$true] %s59_s17 }
  0x36   :  { %p632_p11 = scmp.lt.u32.totalorder %s628_s21, %s834_s5 }
  0x38   :  { %p634_p12 = pnand %p632_p11, %p629_p10 }
  0x3a   :  { %637 = shalt.err (!%p634_p12)
}
  0x3b   :  { %s638_s1 = scalar_lea.vmem %s60_s17, 2048  ;;  %p643_p0 = scmp.lt.s32.totalorder %s60_s17, %s60_s17 }
  0x3c   :  { %p639_p13 = scmp.ne.s32.totalorder %s60_s17, %s638_s1  ;;  %p644_p1 = scmp.lt.s32.totalorder %s638_s1, %s638_s1 }
  0x3e   :  { %p645_p2 = por %p644_p1, %p643_p0 }
  0x40   :  { %p646_p3 = pnand %p645_p2, %p639_p13 }
  0x42   :  { %649 = shalt.err (!%p646_p3)
}
  0x43   :  { %65 = dma.hbm_to_vmem [thread:$0]  %s834_s5, 2048, %s60_s17, [#allocation9], %s681_s11, %s681_s11, %s682_s12  }
  0x44   :  { %672 = dma.done.wait [#allocation3], 128  }
  0x45   :  { %673 = vsyncadd [#allocation3], 4294967168 }
  0x46   :  { %674 = dma.done.wait [#allocation6], 2560  }
  0x47   :  { %675 = vsyncadd [#allocation6], 4294964736 }
  0x48   :  { %676 = dma.done.wait [#allocation9], 2048  }
  0x49   :  { %677 = vsyncadd [#allocation9], 4294965248  ;;  %v686_v0 = vmov 0.0|0.0   ;;  %vm687_vm0 = vmmov 0   ;;  %v688_v1 = vmov 0.0   ;;  %v81_v2 = vld [vmem:[#allocation5] sm:$0xff] }
  0x4a   :  { %498 = vmatprep.subr.bf16.mxu0 %v686_v0  ;;  %425 = vmatprep.mubr.msk.f32.mxu0 %vm687_vm0, %v688_v1  ;;  %v82_v3 = vld [vmem:[#allocation5 + $0x8] sm:$0xff]  ;;  %v83_v4 = vld [vmem:[#allocation5 + $0x10] sm:$0xff]  ;;  %v84_v6 = vld [vmem:[#allocation5 + $0x18] sm:$0xff]  ;;  %vm92_vm1 = vcmask 261120   ;;  %s689_s28 = smov [#allocation10]   ;;  %vm355_vm2 = vcmask 64512  }
  0x4b   :  { %504 = vmatprep.subr.bf16.mxu1 %v686_v0  ;;  %460 = vmatprep.mubr.msk.f32.mxu1 %vm687_vm0, %v688_v1  ;;  %v499_v5 = vpack.c.bf16 %v82_v3, %v81_v2  ;;  %v167_v7 = vld [vmem:[#allocation7] sm:$0xff]  ;;  %v168_v8 = vld [vmem:[#allocation7 + $0x8] sm:$0xff]  ;;  %v169_v9 = vld [vmem:[#allocation7 + $0x10] sm:$0xff]  ;;  %v502_v11 = vpack.c.bf16 %v84_v6, %v83_v4  ;;  %s363_s29 = sshll.u32 %s689_s28, 4  ;;  %s364_s29 = int_to_ptr.vmem [resolvable:$true] %s363_s29 }
  0x4c   :  { %v170_v10 = vld [vmem:[#allocation7 + $0x18] sm:$0xff]  ;;  %v505_v12 = vpack.c.bf16 %v168_v8, %v167_v7  ;;  %v171_v14 = vld [vmem:[#allocation7 + $0x20] sm:$0xff]  ;;  %v172_v15 = vld [vmem:[#allocation7 + $0x28] sm:$0xff]  ;;  %s650_s30 = scalar_lea.vmem %s364_s29, 128  ;;  %p655_p5 = scmp.lt.s32.totalorder %s364_s29, %s364_s29 }
  0x4d   :  { %500 = vmatpush3.bf16.msra.mxu0 %v499_v5  ;;  %v508_v13 = vpack.c.bf16 %v170_v10, %v169_v9  ;;  %v80_v16 = vld [vmem:[#allocation2] sm:$0xff]  ;;  %v511_v17 = vpack.c.bf16 %v172_v15, %v171_v14  ;;  %v173_v18 = vld [vmem:[#allocation7 + $0x30] sm:$0xff]  ;;  %v175_v21 = vld [vmem:[#allocation7 + $0x40] sm:$0xff]  ;;  %p651_p4 = scmp.ne.s32.totalorder %s364_s29, %s650_s30  ;;  %p656_p6 = scmp.lt.s32.totalorder %s650_s30, %s650_s30 }
  0x4e   :  { %501 = vmatprep.subr.bf16.mxu0 %v686_v0  ;;  %506 = vmatpush3.bf16.msra.mxu1 %v505_v12  ;;  %v174_v19 = vld [vmem:[#allocation7 + $0x38] sm:$0xff]  ;;  %v176_v22 = vld [vmem:[#allocation7 + $0x48] sm:$0xff]  ;;  %v177_v24 = vld [vmem:[#allocation7 + $0x50] sm:$0xff] }
  0x4f   :  { %507 = vmatprep.subr.bf16.mxu1 %v686_v0  ;;  %v514_v20 = vpack.c.bf16 %v174_v19, %v173_v18  ;;  %v517_v23 = vpack.c.bf16 %v176_v22, %v175_v21  ;;  %v178_v25 = vld [vmem:[#allocation7 + $0x58] sm:$0xff]  ;;  %v179_v27 = vld [vmem:[#allocation7 + $0x60] sm:$0xff]  ;;  %v180_v28 = vld [vmem:[#allocation7 + $0x68] sm:$0xff]  ;;  %p657_p7 = por %p656_p6, %p655_p5 }
  0x50   :  { %v520_v26 = vpack.c.bf16 %v178_v25, %v177_v24  ;;  %v523_v29 = vpack.c.bf16 %v180_v28, %v179_v27  ;;  %v181_v30 = vld [vmem:[#allocation7 + $0x70] sm:$0xff]  ;;  %v182_v31 = vld [vmem:[#allocation7 + $0x78] sm:$0xff]  ;;  %v261_v33 = vld [vmem:[#allocation8] sm:$0xff] }
  0x51   :  { %503 = vmatpush3.bf16.msra.mxu0 %v502_v11  ;;  %v526_v32 = vpack.c.bf16 %v182_v31, %v181_v30  ;;  %v262_v34 = vld [vmem:[#allocation8 + $0x8] sm:$0xff]  ;;  %v263_v35 = vld [vmem:[#allocation8 + $0x10] sm:$0xff]  ;;  %v264_v37 = vld [vmem:[#allocation8 + $0x18] sm:$0xff]  ;;  %p658_p8 = pnand %p657_p7, %p651_p4 }
  0x52   :  { %528 = vmatprep.subr.bf16.mxu0 %v686_v0  ;;  %509 = vmatpush3.bf16.msra.mxu1 %v508_v13  ;;  %v529_v36 = vpack.c.bf16 %v262_v34, %v261_v33  ;;  %v532_v38 = vpack.c.bf16 %v264_v37, %v263_v35  ;;  %v265_v39 = vld [vmem:[#allocation8 + $0x20] sm:$0xff]  ;;  %v266_v40 = vld [vmem:[#allocation8 + $0x28] sm:$0xff]  ;;  %v267_v42 = vld [vmem:[#allocation8 + $0x30] sm:$0xff] }
  0x53   :  { %510 = vmatprep.subr.bf16.mxu1 %v686_v0  ;;  %v535_v41 = vpack.c.bf16 %v266_v40, %v265_v39  ;;  %v268_v43 = vld [vmem:[#allocation8 + $0x38] sm:$0xff]  ;;  %v269_v45 = vld [vmem:[#allocation8 + $0x40] sm:$0xff]  ;;  %v270_v46 = vld [vmem:[#allocation8 + $0x48] sm:$0xff] }
  0x54   :  { %426 = vmatmul.mubr.msk.f32.vlgmr.msra.gmra.mrb[0].mxu0 %vm92_vm1, %v80_v16  ;;  %v538_v44 = vpack.c.bf16 %v268_v43, %v267_v42  ;;  %v541_v47 = vpack.c.bf16 %v270_v46, %v269_v45  ;;  %v271_v48 = vld [vmem:[#allocation8 + $0x50] sm:$0xff]  ;;  %v272_v49 = vld [vmem:[#allocation8 + $0x58] sm:$0xff]  ;;  %v273_v51 = vld [vmem:[#allocation8 + $0x60] sm:$0xff] }
  0x55   :  { %495 = vmatprep.mubr.msk.f32.mxu0 %vm687_vm0, %v688_v1  ;;  %530 = vmatpush3.bf16.msra.mxu0 %v529_v36  ;;  %v544_v50 = vpack.c.bf16 %v272_v49, %v271_v48  ;;  %v274_v52 = vld [vmem:[#allocation8 + $0x68] sm:$0xff]  ;;  %v374_v54 = vld [vmem:[%s831_s2] ss:$0 sm:$0xff]  ;;  %v275_v59 = vld [vmem:[#allocation8 + $0x70] sm:$0xff] }
  0x56   :  { %512 = vmatpush3.bf16.msra.mxu1 %v511_v17  ;;  %531 = vmatprep.subr.bf16.mxu0 %v686_v0  ;;  %v547_v53 = vpack.c.bf16 %v274_v52, %v273_v51  ;;  %v276_v60 = vld [vmem:[#allocation8 + $0x78] sm:$0xff] }
  0x57   :  { %513 = vmatprep.subr.bf16.mxu1 %v686_v0  ;;  %v550_v61 = vpack.c.bf16 %v276_v60, %v275_v59  ;;  %v376_v62 = vld [vmem:[%s833_s4] ss:$0 sm:$0xff] }
  0x58   :  { %v377_v3 = vld [vmem:[%s835_s6] ss:$0 sm:$0xff] }
  0x59   :  { %533 = vmatpush3.bf16.msra.mxu0 %v532_v38 }
  0x5a   :  { %515 = vmatpush3.bf16.msra.mxu1 %v514_v20  ;;  %534 = vmatprep.subr.bf16.mxu0 %v686_v0 }
  0x5b   :  { %516 = vmatprep.subr.bf16.mxu1 %v686_v0 }
  0x5d   :  { %536 = vmatpush3.bf16.msra.mxu0 %v535_v41 }
  0x5e   :  { %518 = vmatpush3.bf16.msra.mxu1 %v517_v23  ;;  %537 = vmatprep.subr.bf16.mxu0 %v686_v0 }
  0x5f   :  { %519 = vmatprep.subr.bf16.mxu1 %v686_v0 }
  0x61   :  { %539 = vmatpush3.bf16.msra.mxu0 %v538_v44 }
  0x62   :  { %521 = vmatpush3.bf16.msra.mxu1 %v520_v26  ;;  %540 = vmatprep.subr.bf16.mxu0 %v686_v0 }
  0x63   :  { %522 = vmatprep.subr.bf16.mxu1 %v686_v0 }
  0x65   :  { %542 = vmatpush3.bf16.msra.mxu0 %v541_v47 }
  0x66   :  { %524 = vmatpush3.bf16.msra.mxu1 %v523_v29  ;;  %543 = vmatprep.subr.bf16.mxu0 %v686_v0 }
  0x67   :  { %525 = vmatprep.subr.bf16.mxu1 %v686_v0 }
  0x69   :  { %545 = vmatpush3.bf16.msra.mxu0 %v544_v50 }
  0x6a   :  { %527 = vmatpush3.bf16.msra.mxu1 %v526_v32  ;;  %546 = vmatprep.subr.bf16.mxu0 %v686_v0 }
  0x6d   :  { %548 = vmatpush3.bf16.msra.mxu0 %v547_v53 }
  0x6e   :  { %549 = vmatprep.subr.bf16.mxu0 %v686_v0 }
  0x71   :  { %551 = vmatpush3.bf16.msra.mxu0 %v550_v61 }
 0x127   :  { %v162_v55 = vpop.f32.mrb[0].mxu0 }
 0x128   :  { %v163_v56 = vadd.f32 %v374_v54, %v162_v55  ;;  %v427_v57 = vpop.f32.mrb[1].mxu0 }
 0x12a   :  { %v166_v58 = vmax.f32 %v163_v56, 0.0 }
 0x12c   :  { %461 = vmatmul.mubr.f32.vlgmr.msra.gmra.mrb[0].mxu1 %v166_v58 }
 0x1ff   :  { %v256_v63 = vpop.f32.mrb[0].mxu1 }
 0x200   :  { %v257_v1 = vadd.f32 %v376_v62, %v256_v63  ;;  %v462_v0 = vpop.f32.mrb[1].mxu1 }
 0x202   :  { %v260_v2 = vmax.f32 %v257_v1, 0.0 }
 0x204   :  { %496 = vmatmul.mubr.f32.vlgmr.msra.gmra.mrb[2].mxu0 %v260_v2 }
 0x2d7   :  { %v343_v4 = vpop.f32.mrb[2].mxu0 }
 0x2d8   :  { %v354_v5 = vadd.f32 %v377_v3, %v343_v4  ;;  %v497_v6 = vpop.f32.mrb[3].mxu0 }
 0x2da   :  { %356 = vst.msk [vmem:[#allocation10] sm:$0xff] %vm355_vm2, %v354_v5 }
 0x2db   :  { %661 = shalt.err (!%p658_p8)
}
 0x2dc   :  { %s662_s9 = scalar_lea.hbm %s836_s7, 128 }
 0x2dd   :  { %p663_p9 = scmp.ne.s32.totalorder %s836_s7, %s662_s9  ;;  %p666_p10 = scmp.lt.u32.totalorder %s662_s9, %s836_s7 }
 0x2df   :  { %p668_p11 = pnand %p666_p10, %p663_p9 }
 0x2e1   :  { %671 = shalt.err (!%p668_p11)
}
 0x2e2   :  { %366 = dma.vmem_to_hbm [thread:$0]  %s364_s29, 128, %s836_s7, [#allocation4]  }
 0x2e3   :  { %678 = dma.done.wait [#allocation4], 128  }
 0x2e4   :  { %679 = vsyncadd [#allocation4], 4294967168 }
 0x2e5   :  { %370 = vsyncpa [#allocation3], 1 }
 0x2e6   :  { %371 = vsyncpa [#allocation6], 1 }
 0x2e7   :  { %372 = vsyncpa [#allocation9], 1 }
 0x2e8   :  { %373 = vsyncpa [#allocation4], 1 }

</bundles_post_ra>
